<compile_context>
chip_gen: v7x
topology: tpu7x:2x2x1
jax: 0.10.0
libtpu: 0.0.40
codegen_flags: <defaults>
</compile_context>

<pallas_src>
import functools

import jax
import jax.numpy as jnp
from jax.experimental import pallas as pl
from jax.experimental.pallas import tpu as pltpu


def _symmetry_loss_kernel(x_ref, d_ref, o_ref, acc_ref, *,
                          block_rows, sub_rows, rows_valid,
                          need_mask, mask_start):
    c = pl.program_id(0)
    i = pl.program_id(1)
    n_inner = pl.num_programs(1)
    step = c * n_inner + i
    num_sub = block_rows // sub_rows

    @pl.when(i == 0)
    def _init():
        acc_ref[...] = jnp.zeros_like(acc_ref)

    def _chunk(r0, masked):
        x = x_ref[pl.ds(r0, sub_rows), :]
        if masked:
            # Zero rows past the logical end of the flattened tensor (partial
            # tail tile / fully-duplicated clamped tile).
            row_ids = jax.lax.broadcasted_iota(jnp.int32, x.shape, 0)
            valid = (step * block_rows + r0 + row_ids) < rows_valid
            x = jnp.where(valid, x, jnp.zeros_like(x))
        # Fused flip + subtract: one native-dtype matmul against the constant
        # +/-1 difference matrix (half the columns of a full permutation).
        xd = jnp.dot(x, d_ref[...], preferred_element_type=jnp.float32)
        dd = xd * xd
        lc = dd.shape[-1]
        # Cheap vreg adds into an (8, Lc) accumulator; the full cross-lane /
        # cross-sublane reduction happens once per core in _finalize.
        acc_ref[...] += jnp.sum(dd.reshape(sub_rows // 8, 8, lc), axis=0)

    def _tile(masked):
        if num_sub == 1:
            _chunk(0, masked)
        else:
            def body(s, carry):
                _chunk(pl.multiple_of(s * sub_rows, sub_rows), masked)
                return carry
            jax.lax.fori_loop(0, num_sub, body, 0)

    if need_mask:
        # Only tiles at/after `mask_start` can touch invalid rows; all other
        # tiles take the mask-free fast path.
        @pl.when(step < mask_start)
        def _full_tile():
            _tile(False)

        @pl.when(step >= mask_start)
        def _masked_tile():
            _tile(True)
    else:
        _tile(False)

    @pl.when(i == n_inner - 1)
    def _finalize():
        o_ref[0] = jnp.sum(acc_ref[...], keepdims=True)


def symmetry_loss(out, *, vmem_tile_bytes=16 * 1024 * 1024):
    """Pallas implementation of SymmetryLoss.forward (returns an f32 scalar)."""
    assert out.ndim == 4, "expected NCHW input"
    n, ch, h, w = out.shape
    total = n * ch * h * w
    rows = n * ch * h

    if total == 0 or w < 2:
        # Flip along W is the identity (or the tensor is empty): MSE == 0.
        return jnp.float32(0.0)

    # ---- lane-dense packing: k width-rows per L = k*w lane row --------------
    if w >= 128:
        # TODO(synk): for very large W, decompose the flip into a reversal of
        # 128-lane blocks plus one fixed 128-wide difference matmul instead of
        # a (W, W/2) matrix (keeps MXU cost and VMEM constant).
        k = 1
    else:
        kmax = max(1, min(256 // w, rows))   # target L <= 256 (v6e/v7x MXU depth)
        k = 1
        for cand in range(kmax, 0, -1):
            if rows % cand == 0:
                k = cand
                break
    L = k * w
    rows2 = rows // k
    x2 = out.reshape(rows2, L)               # metadata-only reshape (contiguous)

    # ---- constant +/-1 difference matrix (flip + subtract fused) ------------
    hw = w // 2
    Lc = k * hw
    col = jnp.arange(Lc, dtype=jnp.int32)
    g, p = col // hw, col % hw
    plus_row = g * w + p
    minus_row = g * w + (w - 1 - p)
    row = jnp.arange(L, dtype=jnp.int32)[:, None]
    dmat = ((row == plus_row[None, :]).astype(jnp.float32)
            - (row == minus_row[None, :]).astype(jnp.float32)).astype(x2.dtype)

    # ---- tile sizing ---------------------------------------------------------
    itemsize = x2.dtype.itemsize
    row_mult = max(8, 32 // itemsize)        # 8 (f32), 16 (bf16), 32 (int8/fp8)
    bytes_per_row = L * itemsize
    block_rows = min(rows2, max(1, vmem_tile_bytes // bytes_per_row))
    block_rows = max(row_mult, (block_rows // row_mult) * row_mult)
    if block_rows > 512:                     # chunk in-kernel compute
        block_rows = (block_rows // 512) * 512
        sub_rows = 512
    else:
        sub_rows = block_rows

    n_steps = pl.cdiv(rows2, block_rows)
    # Always split the step range across two TensorCores when there is more
    # than one step (v7x megacore); a sequential size-2 axis is harmless on
    # single-core v5e/v6e.
    n_outer = 2 if n_steps >= 2 else 1
    n_inner = pl.cdiv(n_steps, n_outer)
    total_steps = n_outer * n_inner
    full_steps = rows2 // block_rows          # steps with no invalid rows
    need_mask = total_steps > full_steps
    mask_start = full_steps

    if total_steps > n_steps:
        # Odd step count + 2-core split: clamp the duplicated trailing step
        # onto the last real block (its rows are zeroed by the mask).
        x_map = lambda c_, i_: (jnp.minimum(c_ * n_inner + i_, n_steps - 1), 0)
    else:
        x_map = lambda c_, i_: (c_ * n_inner + i_, 0)

    # Scoped-VMEM limit scales with the tile: double-buffered input + the
    # D matrix + per-chunk f32 temporaries + headroom; stays below v7x's
    # 64 MiB physical VMEM at the default tile size.
    lc_pad = max(Lc, 128)
    vmem_need = (2 * block_rows * bytes_per_row
                 + 2 * L * lc_pad * itemsize
                 + 6 * sub_rows * lc_pad * 4
                 + 2 * 1024 * 1024)
    vmem_limit_bytes = int(min(112 * 1024 * 1024,
                               max(32 * 1024 * 1024,
                                   vmem_need + 8 * 1024 * 1024)))

    kernel = functools.partial(
        _symmetry_loss_kernel,
        block_rows=block_rows,
        sub_rows=sub_rows,
        rows_valid=rows2,
        need_mask=need_mask,
        mask_start=mask_start,
    )

    partials = pl.pallas_call(
        kernel,
        out_shape=jax.ShapeDtypeStruct((n_outer, 1, 1), jnp.float32),
        grid_spec=pltpu.PrefetchScalarGridSpec(
            num_scalar_prefetch=0,
            grid=(n_outer, n_inner),
            in_specs=[
                pl.BlockSpec((block_rows, L), x_map),
                # Constant block index -> fetched once and kept resident.
                pl.BlockSpec((L, Lc), lambda c_, i_: (0, 0)),
            ],
            out_specs=pl.BlockSpec((1, 1, 1), lambda c_, i_: (c_, 0, 0)),
            scratch_shapes=[pltpu.VMEM((8, Lc), jnp.float32)],
        ),
        compiler_params=pltpu.CompilerParams(
            dimension_semantics=("parallel", "arbitrary"),
            vmem_limit_bytes=vmem_limit_bytes,
        ),
    )(x2, dmat)

    # Each mirror pair is counted once by the difference matmul -> factor 2.
    return -(2.0 * jnp.sum(partials) / total)


def _reference(x):
    xf = x.astype(jnp.float32)
    return -jnp.mean((xf - jnp.flip(xf, axis=3)) ** 2)


if __name__ == "__main__":
    key = jax.random.PRNGKey(0)
    k1, k2, k3, k4 = jax.random.split(key, 4)

    # 1) Primary case (module's expected NCHW use): single tile, single core.
    x1 = jax.random.normal(k1, (2, 4, 16, 16), dtype=jnp.float32)
    loss1 = jax.block_until_ready(symmetry_loss(x1))
    ref1 = _reference(x1)
    assert jnp.allclose(loss1, ref1, rtol=1e-3, atol=1e-6), (loss1, ref1)

    # 2) Tail-masked tile + 2-core split (tiny forced tile -> 2 grid steps).
    x2 = jax.random.normal(k2, (2, 4, 20, 16), dtype=jnp.float32)
    loss2 = jax.block_until_ready(symmetry_loss(x2, vmem_tile_bytes=8 * 1024))
    ref2 = _reference(x2)
    assert jnp.allclose(loss2, ref2, rtol=1e-3, atol=1e-6), (loss2, ref2)

    # 3) bf16 + odd step count (duplicated clamped tile on the 2-core split).
    x3 = jax.random.normal(k3, (6, 4, 32, 16), dtype=jnp.bfloat16)
    loss3 = jax.block_until_ready(symmetry_loss(x3, vmem_tile_bytes=8 * 1024))
    ref3 = _reference(x3)
    assert jnp.allclose(loss3, ref3, rtol=1e-3, atol=1e-6), (loss3, ref3)

    # 4) Larger input exercising the in-kernel sub-chunk loop (num_sub > 1).
    x4 = jax.random.normal(k4, (8, 8, 256, 16), dtype=jnp.float32)
    loss4 = jax.block_until_ready(symmetry_loss(x4))
    ref4 = _reference(x4)
    assert jnp.allclose(loss4, ref4, rtol=1e-3, atol=1e-6), (loss4, ref4)

    print("KERNEL_OK")
</pallas_src>

<mosaic_0001>
module attributes {stable_mosaic.version = 11 : i64} {
  func.func @_symmetry_loss_kernel(%arg0: i32, %arg1: i32, %arg2: memref<8x256xf32, #tpu.memory_space<vmem>>, %arg3: memref<256x128xf32, #tpu.memory_space<vmem>>, %arg4: memref<1x1x1xf32, #tpu.memory_space<vmem>>, %arg5: memref<8x128xf32, #tpu.memory_space<vmem>>) attributes {dimension_semantics = [#tpu.dimension_semantics<parallel>, #tpu.dimension_semantics<arbitrary>], iteration_bounds = array<i64: 1, 1>, scalar_prefetch = 0 : i64, scratch_operands = 1 : i64, tpu.core_type = #tpu.core_type<tc>, window_params = [{transform_indices = @transform_0, window_bounds = array<i64: 8, 256>}, {pipeline_mode = #tpu.pipeline_mode<synchronous>, transform_indices = @transform_1, window_bounds = array<i64: 256, 128>}, {transform_indices = @transform_2, window_bounds = array<i64: 1, 1, 1>}]} {
    %c0_i32 = arith.constant 0 : i32
    %0 = arith.cmpi eq, %arg1, %c0_i32 : i32
    %1 = arith.extui %0 : i1 to i32
    %c0_i32_0 = arith.constant 0 : i32
    %2 = arith.cmpi ne, %1, %c0_i32_0 : i32
    scf.if %2 {
      %cst_11 = arith.constant 0.000000e+00 : f32
      %15 = vector.broadcast %cst_11 : f32 to vector<8x128xf32>
      %c0_12 = arith.constant 0 : index
      %c0_13 = arith.constant 0 : index
      %16 = vector.load %arg5[%c0_12, %c0_13] : memref<8x128xf32, #tpu.memory_space<vmem>>, vector<8x128xf32>
      tpu.vector_store %arg5[%c0_12, %c0_13], %15 {strides = array<i32>} : memref<8x128xf32, #tpu.memory_space<vmem>>, vector<8x128xf32>,
    } else {
    }
    %c0 = arith.constant 0 : index
    %c0_1 = arith.constant 0 : index
    %3 = vector.load %arg2[%c0, %c0_1] : memref<8x256xf32, #tpu.memory_space<vmem>>, vector<8x256xf32>
    %c0_2 = arith.constant 0 : index
    %c0_3 = arith.constant 0 : index
    %4 = vector.load %arg3[%c0_2, %c0_3] : memref<256x128xf32, #tpu.memory_space<vmem>>, vector<256x128xf32>
    %cst = arith.constant dense<0.000000e+00> : vector<8x128xf32>
    %5 = tpu.matmul %3, %4, %cst {dimension_numbers = #tpu.dot_dimension_numbers<[1], [0], [0], [1], [0, 0, 1, 1], [], []>} : vector<8x256xf32>, vector<256x128xf32>, vector<8x128xf32> -> vector<8x128xf32>
    %6 = arith.mulf %5, %5 : vector<8x128xf32>
    %c0_4 = arith.constant 0 : index
    %c0_5 = arith.constant 0 : index
    %7 = vector.load %arg5[%c0_4, %c0_5] : memref<8x128xf32, #tpu.memory_space<vmem>>, vector<8x128xf32>
    %8 = vector.shape_cast %6 : vector<8x128xf32> to vector<1x8x128xf32>
    %cst_6 = arith.constant dense<0.000000e+00> : vector<8x128xf32>
    %9 = vector.multi_reduction <add>, %8, %cst_6 [0] : vector<1x8x128xf32> to vector<8x128xf32>
    %10 = arith.addf %7, %9 : vector<8x128xf32>
    %c0_7 = arith.constant 0 : index
    %c0_8 = arith.constant 0 : index
    %11 = vector.load %arg5[%c0_7, %c0_8] : memref<8x128xf32, #tpu.memory_space<vmem>>, vector<8x128xf32>
    tpu.vector_store %arg5[%c0_7, %c0_8], %10 {strides = array<i32>} : memref<8x128xf32, #tpu.memory_space<vmem>>, vector<8x128xf32>,
    %c0_i32_9 = arith.constant 0 : i32
    %12 = arith.cmpi eq, %arg1, %c0_i32_9 : i32
    %13 = arith.extui %12 : i1 to i32
    %c0_i32_10 = arith.constant 0 : i32
    %14 = arith.cmpi ne, %13, %c0_i32_10 : i32
    scf.if %14 {
      %c0_11 = arith.constant 0 : index
      %c0_12 = arith.constant 0 : index
      %15 = vector.load %arg5[%c0_11, %c0_12] : memref<8x128xf32, #tpu.memory_space<vmem>>, vector<8x128xf32>
      %16 = vector.shape_cast %15 : vector<8x128xf32> to vector<1x8x128xf32>
      %cst_13 = arith.constant dense<0.000000e+00> : vector<1xf32>
      %17 = vector.multi_reduction <add>, %16, %cst_13 [1, 2] : vector<1x8x128xf32> to vector<1xf32>
      %18 = vector.shape_cast %17 : vector<1xf32> to vector<1x1x1xf32>
      %19 = vector.extract %18[0, 0, 0] : f32 from vector<1x1x1xf32>
      %20 = vector.broadcast %19 : f32 to vector<1x1xf32>
      %c0_14 = arith.constant 0 : index
      %c0_15 = arith.constant 0 : index
      %c0_16 = arith.constant 0 : index
      %21 = vector.load %arg4[%c0_14, %c0_15, %c0_16] : memref<1x1x1xf32, #tpu.memory_space<vmem>>, vector<1x1x1xf32>
      %22 = vector.shape_cast %21 : vector<1x1x1xf32> to vector<1x1xf32>
      %23 = vector.shape_cast %20 : vector<1x1xf32> to vector<1x1x1xf32>
      tpu.vector_store %arg4[%c0_14, %c0_15, %c0_16], %23 {strides = array<i32>} : memref<1x1x1xf32, #tpu.memory_space<vmem>>, vector<1x1x1xf32>,
    } else {
    }
    return
  }
  func.func @transform_0(%arg0: i32, %arg1: i32) -> (i32, i32) {
    %c1_i32 = arith.constant 1 : i32
    %0 = arith.muli %arg0, %c1_i32 : i32
    %1 = arith.addi %0, %arg1 : i32
    %c0_i32 = arith.constant 0 : i32
    %c0_i32_0 = arith.constant 0 : i32
    return %1, %c0_i32 : i32, i32
  }
  func.func @transform_1(%arg0: i32, %arg1: i32) -> (i32, i32) {
    %c0_i32 = arith.constant 0 : i32
    %c0_i32_0 = arith.constant 0 : i32
    %c0_i32_1 = arith.constant 0 : i32
    return %c0_i32, %c0_i32_0 : i32, i32
  }
  func.func @transform_2(%arg0: i32, %arg1: i32) -> (i32, i32, i32) {
    %c0_i32 = arith.constant 0 : i32
    %c0_i32_0 = arith.constant 0 : i32
    %c0_i32_1 = arith.constant 0 : i32
    return %arg0, %c0_i32, %c0_i32_0 : i32, i32, i32
  }
}

</mosaic_0001>

<bundles_post_ra>
// kernel: tpu_custom_call.1
= control target key start
LH: loop header
LB: loop body
LE: loop exit
PB: predicated region body
PF: predicated region fallthrough
CT: control target
= control target key end

     0   :  { %7 = vsyncpa [#allocation4], 0  ;;  %s398_s0 = inlined_call_operand.hbm [shape: f32[8,256], index: 0, kind: input, shape index: {}]   ;;  %s399_s1 = inlined_call_operand.hbm [shape: f32[256,128], index: 1, kind: input, shape index: {}]   ;;  %s400_s2 = inlined_call_operand.hbm [shape: f32[1,1,1], index: 2, kind: output, shape index: {}]  }
   0x1   :  { %8 = vsyncpa [#allocation7], 0 }
   0x2   :  { %9 = vsyncpa [#allocation5], 0  ;;  %s335_s9 = smov [#allocation3]   ;;  %s336_s11 = smov [#allocation6]  }
   0x3   :  { %s20_s10 = sshll.u32 %s335_s9, 4  ;;  %s29_s12 = sshll.u32 %s336_s11, 4  ;;  %s21_s10 = int_to_ptr.vmem [resolvable:$true] %s20_s10  ;;  %s355_s12 = int_to_ptr.vmem [resolvable:$true] %s29_s12 }
   0x4   :  { %s263_s15 = scalar_lea.hbm %s398_s0, 256 }
   0x5   :  { %p264_p0 = scmp.ne.s32.totalorder %s398_s0, %s263_s15  ;;  %p267_p1 = scmp.lt.u32.totalorder %s263_s15, %s398_s0 }
   0x7   :  { %p269_p2 = pnand %p267_p1, %p264_p0 }
   0x9   :  { %272 = shalt.err (!%p269_p2)
}
   0xa   :  { %s273_s20 = scalar_lea.vmem %s21_s10, 256  ;;  %p278_p4 = scmp.lt.s32.totalorder %s21_s10, %s21_s10 }
   0xb   :  { %p274_p3 = scmp.ne.s32.totalorder %s21_s10, %s273_s20  ;;  %p279_p5 = scmp.lt.s32.totalorder %s273_s20, %s273_s20 }
   0xd   :  { %p280_p6 = por %p279_p5, %p278_p4 }
   0xf   :  { %p281_p7 = pnand %p280_p6, %p274_p3 }
  0x11   :  { %284 = shalt.err (!%p281_p7)
}
  0x12   :  { %23 = dma.hbm_to_vmem [thread:$0]  %s398_s0, 256, %s21_s10, [#allocation4]  }
  0x13   :  { %s285_s25 = scalar_lea.hbm %s399_s1, 4096 }
  0x14   :  { %p286_p8 = scmp.ne.s32.totalorder %s399_s1, %s285_s25  ;;  %p289_p9 = scmp.lt.u32.totalorder %s285_s25, %s399_s1 }
  0x16   :  { %p291_p10 = pnand %p289_p9, %p286_p8 }
  0x18   :  { %294 = shalt.err (!%p291_p10)
}
  0x19   :  { %s295_s30 = scalar_lea.vmem %s355_s12, 4096  ;;  %p300_p12 = scmp.lt.s32.totalorder %s355_s12, %s355_s12 }
  0x1a   :  { %p296_p11 = scmp.ne.s32.totalorder %s355_s12, %s295_s30  ;;  %p301_p13 = scmp.lt.s32.totalorder %s295_s30, %s295_s30 }
  0x1c   :  { %p302_p0 = por %p301_p13, %p300_p12 }
  0x1e   :  { %p303_p1 = pnand %p302_p0, %p296_p11 }
  0x20   :  { %306 = shalt.err (!%p303_p1)
}
  0x21   :  { %s337_s0 = smov 128   ;;  %s338_s3 = smov 8  }
  0x22   :  { %35 = dma.hbm_to_vmem [thread:$0]  %s399_s1, 4096, %s355_s12, [#allocation7], %s337_s0, %s337_s0, %s338_s3  }
  0x23   :  { %329 = dma.done.wait [#allocation4], 256  }
  0x24   :  { %330 = vsyncadd [#allocation4], 4294967040 }
  0x25   :  { %331 = dma.done.wait [#allocation7], 4096  }
  0x26   :  { %332 = vsyncadd [#allocation7], 4294963200  ;;  %v66_v0 = vld [vmem:[#allocation6 + $0x80] sm:$0xff]  ;;  %v67_v1 = vld [vmem:[#allocation6 + $0x88] sm:$0xff]  ;;  %s339_s1 = smov [#allocation8]   ;;  %vm171_vm0 = vcmask 0  }
  0x27   :  { %v50_v2 = vld [vmem:[#allocation6] sm:$0xff]  ;;  %v224_v3 = vpack.c.bf16 %v67_v1, %v66_v0  ;;  %v51_v4 = vld [vmem:[#allocation6 + $0x8] sm:$0xff]  ;;  %v68_v5 = vld [vmem:[#allocation6 + $0x90] sm:$0xff]  ;;  %s179_s6 = sshll.u32 %s339_s1, 4  ;;  %s180_s6 = int_to_ptr.vmem [resolvable:$true] %s179_s6 }
  0x28   :  { %v69_v6 = vld [vmem:[#allocation6 + $0x98] sm:$0xff]  ;;  %v226_v7 = vpack.c.bf16 %v51_v4, %v50_v2  ;;  %v52_v9 = vld [vmem:[#allocation6 + $0x10] sm:$0xff]  ;;  %v70_v11 = vld [vmem:[#allocation6 + $0xa0] sm:$0xff]  ;;  %s307_s8 = scalar_lea.vmem %s180_s6, 16  ;;  %s311_s9 = scalar_lea.vmem %s180_s6, 32 }
  0x29   :  { %v228_v8 = vpack.c.bf16 %v69_v6, %v68_v5  ;;  %v53_v10 = vld [vmem:[#allocation6 + $0x18] sm:$0xff]  ;;  %225 = vmatprep.subr.bf16.mxu0 %v224_v3  ;;  %v71_v12 = vld [vmem:[#allocation6 + $0xa8] sm:$0xff]  ;;  %v54_v15 = vld [vmem:[#allocation6 + $0x20] sm:$0xff]  ;;  %p308_p2 = scmp.ne.s32.totalorder %s180_s6, %s307_s8  ;;  %p312_p3 = scmp.lt.s32.totalorder %s180_s6, %s180_s6 }
  0x2a   :  { %227 = vmatpush3.bf16.msra.mxu0 %v226_v7  ;;  %v230_v13 = vpack.c.bf16 %v53_v10, %v52_v9  ;;  %v232_v14 = vpack.c.bf16 %v71_v12, %v70_v11  ;;  %v55_v16 = vld [vmem:[#allocation6 + $0x28] sm:$0xff]  ;;  %v72_v17 = vld [vmem:[#allocation6 + $0xb0] sm:$0xff]  ;;  %v73_v18 = vld [vmem:[#allocation6 + $0xb8] sm:$0xff]  ;;  %p313_p4 = scmp.lt.s32.totalorder %s311_s9, %s307_s8 }
  0x2b   :  { %229 = vmatprep.subr.bf16.mxu0 %v228_v8  ;;  %v234_v19 = vpack.c.bf16 %v55_v16, %v54_v15  ;;  %v236_v20 = vpack.c.bf16 %v73_v18, %v72_v17  ;;  %v56_v21 = vld [vmem:[#allocation6 + $0x30] sm:$0xff]  ;;  %v57_v22 = vld [vmem:[#allocation6 + $0x38] sm:$0xff]  ;;  %v74_v23 = vld [vmem:[#allocation6 + $0xc0] sm:$0xff] }
  0x2c   :  { %v75_v24 = vld [vmem:[#allocation6 + $0xc8] sm:$0xff]  ;;  %v49_v25 = vld [vmem:[#allocation3 + $0x8] sm:$0xff]  ;;  %v238_v26 = vpack.c.bf16 %v57_v22, %v56_v21  ;;  %v58_v28 = vld [vmem:[#allocation6 + $0x40] sm:$0xff]  ;;  %p314_p5 = por %p313_p4, %p312_p3 }
  0x2d   :  { %146 = vmatprep.mubr.f32.mxu0 %v49_v25  ;;  %v240_v27 = vpack.c.bf16 %v75_v24, %v74_v23  ;;  %v59_v29 = vld [vmem:[#allocation6 + $0x48] sm:$0xff]  ;;  %v76_v30 = vld [vmem:[#allocation6 + $0xd0] sm:$0xff]  ;;  %v77_v31 = vld [vmem:[#allocation6 + $0xd8] sm:$0xff] }
  0x2e   :  { %231 = vmatpush3.bf16.msra.mxu0 %v230_v13  ;;  %v242_v32 = vpack.c.bf16 %v59_v29, %v58_v28  ;;  %v244_v33 = vpack.c.bf16 %v77_v31, %v76_v30  ;;  %v60_v34 = vld [vmem:[#allocation6 + $0x50] sm:$0xff]  ;;  %v61_v35 = vld [vmem:[#allocation6 + $0x58] sm:$0xff]  ;;  %v78_v36 = vld [vmem:[#allocation6 + $0xe0] sm:$0xff]  ;;  %p315_p6 = pnand %p314_p5, %p308_p2 }
  0x2f   :  { %233 = vmatprep.subr.bf16.mxu0 %v232_v14  ;;  %v79_v37 = vld [vmem:[#allocation6 + $0xe8] sm:$0xff]  ;;  %v246_v38 = vpack.c.bf16 %v61_v35, %v60_v34  ;;  %v62_v40 = vld [vmem:[#allocation6 + $0x60] sm:$0xff]  ;;  %v80_v42 = vld [vmem:[#allocation6 + $0xf0] sm:$0xff] }
  0x30   :  { %v248_v39 = vpack.c.bf16 %v79_v37, %v78_v36  ;;  %v63_v41 = vld [vmem:[#allocation6 + $0x68] sm:$0xff]  ;;  %v81_v43 = vld [vmem:[#allocation6 + $0xf8] sm:$0xff]  ;;  %v64_v46 = vld [vmem:[#allocation6 + $0x70] sm:$0xff] }
  0x31   :  { %v250_v44 = vpack.c.bf16 %v63_v41, %v62_v40  ;;  %v252_v45 = vpack.c.bf16 %v81_v43, %v80_v42  ;;  %v65_v47 = vld [vmem:[#allocation6 + $0x78] sm:$0xff]  ;;  %v48_v49 = vld [vmem:[#allocation3] sm:$0xff] }
  0x32   :  { %235 = vmatpush3.bf16.msra.mxu0 %v234_v19  ;;  %v254_v48 = vpack.c.bf16 %v65_v47, %v64_v46 }
  0x33   :  { %237 = vmatprep.subr.bf16.mxu0 %v236_v20 }
  0x36   :  { %239 = vmatpush3.bf16.msra.mxu0 %v238_v26 }
  0x37   :  { %241 = vmatprep.subr.bf16.mxu0 %v240_v27 }
  0x3a   :  { %243 = vmatpush3.bf16.msra.mxu0 %v242_v32 }
  0x3b   :  { %245 = vmatprep.subr.bf16.mxu0 %v244_v33 }
  0x3e   :  { %247 = vmatpush3.bf16.msra.mxu0 %v246_v38 }
  0x3f   :  { %249 = vmatprep.subr.bf16.mxu0 %v248_v39 }
  0x42   :  { %251 = vmatpush3.bf16.msra.mxu0 %v250_v44 }
  0x43   :  { %253 = vmatprep.subr.bf16.mxu0 %v252_v45 }
  0x46   :  { %255 = vmatpush3.bf16.msra.mxu0 %v254_v48 }
  0x49   :  { %147 = vmatmul.mubr.f32.vlgmr.msra.gmra.mrb[0].mxu0 %v48_v49 }
 0x11c   :  { %v221_v50 = vpop.f32.mrb[0].mxu0 }
 0x11d   :  { %v222_v51 = vpop.f32.mrb[1].mxu0 }
 0x11e   :  { %v223_v52 = vadd.f32 %v222_v51, %v221_v50 }
 0x120   :  { %v152_v53 = vmul.f32 %v223_v52, %v223_v52 }
 0x122   :  { %161 = vadd.xlane.f32.xlu0 %v152_v53 }
 0x1af   :  { %v162_v54 = vpop.xlane.xlu0 %161 }
 0x1b0   :  { %v163_v55 = vrot.slane %v162_v54, 4 }
 0x1b2   :  { %v164_v56 = vadd.f32 %v163_v55, %v162_v54 }
 0x1b4   :  { %v165_v57 = vrot.slane %v164_v56, 2 }
 0x1b6   :  { %v166_v58 = vadd.f32 %v165_v57, %v164_v56 }
 0x1b8   :  { %v167_v59 = vrot.slane %v166_v58, 1 }
 0x1ba   :  { %v168_v60 = vadd.f32 %v167_v59, %v166_v58 }
 0x1bc   :  { %256 = vpush %v168_v60 }
 0x1ed   :  { %s257_s7 = spop %256 }
 0x1ee   :  { %v170_v61 = vstv %s257_s7 }
 0x1ef   :  { %172 = vst.msk [vmem:[#allocation8] sm:$0x1] %vm171_vm0, %v170_v61 }
 0x1f0   :  { %318 = shalt.err (!%p315_p6)
}
 0x1f1   :  { %s319_s12 = scalar_lea.hbm %s400_s2, 16 }
 0x1f2   :  { %p320_p7 = scmp.ne.s32.totalorder %s400_s2, %s319_s12  ;;  %p323_p8 = scmp.lt.u32.totalorder %s319_s12, %s400_s2 }
 0x1f4   :  { %p325_p9 = pnand %p323_p8, %p320_p7 }
 0x1f6   :  { %328 = shalt.err (!%p325_p9)
}
 0x1f7   :  { %182 = dma.vmem_to_hbm [thread:$0]  %s180_s6, 16, %s400_s2, [#allocation5]  }
 0x1f8   :  { %333 = dma.done.wait [#allocation5], 16  }
 0x1f9   :  { %334 = vsyncadd [#allocation5], 4294967280 }
 0x1fa   :  { %186 = vsyncpa [#allocation4], 1 }
 0x1fb   :  { %187 = vsyncpa [#allocation7], 1 }
 0x1fc   :  { %188 = vsyncpa [#allocation5], 1 }

</bundles_post_ra>
